<compile_context>
chip_gen: v5e
topology: v5e:2x2
jax: 0.10.0
libtpu: 0.0.40
codegen_flags: <defaults>
</compile_context>

<pallas_src>
import functools

import jax
import jax.numpy as jnp
from jax.experimental import pallas as pl
from jax.experimental.pallas import tpu as pltpu


_FUSED_MAX_SLAB_BYTES = 2 << 20   # per-batch slab size under which the fused kernel is used
_TARGET_TILE_BYTES = 1 << 20      # per-block byte target for the L-tiled two-pass path


# ---------------------------------------------------------------------------
# Host-side helpers
# ---------------------------------------------------------------------------

def _vmem_cap_bytes():
    """Chip-aware scoped-VMEM ceiling: 75% of physical (-> ~48 MiB on v7x)."""
    try:
        phys = pltpu.get_tpu_info().vmem_capacity_bytes
    except Exception:
        phys = 128 << 20
    return int(min(64 << 20, (phys * 3) // 4))


def _refold_factor(C, L, itemsize):
    """Smallest r so the sublane dim C*r is dense (>=8 for f32, >=16 for bf16)
    while the lane dim L//r stays a multiple of 128. Returns 1 if impossible."""
    target = 8 if itemsize >= 4 else (16 if itemsize == 2 else 32)
    if C >= target or L % 128 != 0:
        return 1
    r_min = -(-target // C)  # ceil(target / C)
    for r in range(r_min, L // 128 + 1):
        if L % (128 * r) == 0:
            return r
    return 1


def _choose_tile_l(L2, C2, itemsize):
    """Largest 128-aligned divisor of L2 whose block stays near the byte target."""
    if L2 % 128 != 0:
        # TODO(synk): pad-and-mask instead of a full-extent (masked-store) block.
        return L2
    bytes_per_lane = C2 * max(itemsize, 4)
    max_tl = max(128, (_TARGET_TILE_BYTES // bytes_per_lane) // 128 * 128)
    best = 128
    tl = 128
    limit = min(L2, max_tl)
    while tl <= limit:
        if L2 % tl == 0:
            best = tl
        tl += 128
    return best


# ---------------------------------------------------------------------------
# Kernels
# ---------------------------------------------------------------------------

def _fused_kernel(x_ref, w_ref, b_ref, o_ref, *, eps):
    """Single-block path (small slabs only): whole (1, C2, L2) slab in VMEM."""
    x = x_ref[...].astype(jnp.float32)
    m = float(x.size)
    s = jnp.sum(x)
    ss = jnp.sum(x * x)
    mean = s / m
    var = jnp.maximum(ss / m - mean * mean, 0.0)
    inv_std = jax.lax.rsqrt(var + eps)
    scale = w_ref[...] * inv_std            # (1, C2, 1), f32
    shift = b_ref[...] - scale * mean       # (1, C2, 1), f32
    o_ref[...] = (scale * x + shift).astype(o_ref.dtype)


def _stats_kernel(x_ref, w_ref, b_ref, scale_ref, shift_ref, s_ref, ss_ref,
                  *, eps, inv_count):
    """Pass 1: accumulate sum / sum-of-squares over L tiles ('arbitrary' axis),
    finalize folded per-channel (scale, shift) for this batch element."""
    l = pl.program_id(1)

    @pl.when(l == 0)
    def _():
        s_ref[...] = jnp.zeros_like(s_ref)
        ss_ref[...] = jnp.zeros_like(ss_ref)

    x = x_ref[...].astype(jnp.float32)                       # (1, C2, TL)
    s_ref[...] += jnp.sum(x, axis=2, keepdims=True)          # lane reduce per tile
    ss_ref[...] += jnp.sum(x * x, axis=2, keepdims=True)

    @pl.when(l == pl.num_programs(1) - 1)
    def _():
        total = jnp.sum(s_ref[...], keepdims=True)            # (1, 1, 1)
        total_sq = jnp.sum(ss_ref[...], keepdims=True)        # (1, 1, 1)
        mean = total * inv_count
        # TODO(synk): single-pass E[x^2]-mean^2 can cancel when |mean| >> std;
        # switch to Welford/compensated accumulation if that regime matters.
        var = jnp.maximum(total_sq * inv_count - mean * mean, 0.0)
        inv_std = jax.lax.rsqrt(var + eps)
        scale = w_ref[...] * inv_std                           # (1, C2, 1)
        scale_ref[...] = scale
        shift_ref[...] = b_ref[...] - scale * mean


def _apply_kernel(x_ref, scale_ref, shift_ref, o_ref):
    """Pass 2: pure per-element FMA stream, lane-dense blocks, fully parallel."""
    x = x_ref[...].astype(jnp.float32)
    o_ref[...] = (scale_ref[...] * x + shift_ref[...]).astype(o_ref.dtype)


# ---------------------------------------------------------------------------
# pallas_call wrappers
# ---------------------------------------------------------------------------

def _gln_fused(x2, w2, b2, eps):
    N, C2, L2 = x2.shape
    itemsize = jnp.dtype(x2.dtype).itemsize
    vmem_limit = int(min(
        max(4 * C2 * L2 * itemsize + 3 * C2 * L2 * 4 + (4 << 20), 32 << 20),
        _vmem_cap_bytes()))
    return pl.pallas_call(
        functools.partial(_fused_kernel, eps=eps),
        out_shape=jax.ShapeDtypeStruct((N, C2, L2), x2.dtype),
        grid_spec=pltpu.PrefetchScalarGridSpec(
            num_scalar_prefetch=0,
            grid=(N,),
            in_specs=[
                pl.BlockSpec((1, C2, L2), lambda n: (n, 0, 0)),
                pl.BlockSpec((1, C2, 1), lambda n: (0, 0, 0)),
                pl.BlockSpec((1, C2, 1), lambda n: (0, 0, 0)),
            ],
            out_specs=pl.BlockSpec((1, C2, L2), lambda n: (n, 0, 0)),
        ),
        compiler_params=pltpu.CompilerParams(
            dimension_semantics=("parallel",),
            vmem_limit_bytes=vmem_limit,
        ),
        cost_estimate=pl.CostEstimate(
            flops=5 * N * C2 * L2,
            transcendentals=N,
            bytes_accessed=2 * N * C2 * L2 * itemsize,
        ),
    )(x2, w2, b2)


def _gln_two_pass(x2, w2, b2, eps):
    N, C2, L2 = x2.shape
    itemsize = jnp.dtype(x2.dtype).itemsize
    TL = _choose_tile_l(L2, C2, itemsize)
    nL = L2 // TL
    inv_count = 1.0 / float(C2 * L2)
    vmem_limit = int(min(
        max(6 * C2 * TL * max(itemsize, 4) + (4 << 20), 32 << 20),
        _vmem_cap_bytes()))

    # Pass 1: per-batch statistics -> folded per-channel (scale, shift) in f32.
    scale, shift = pl.pallas_call(
        functools.partial(_stats_kernel, eps=eps, inv_count=inv_count),
        out_shape=(jax.ShapeDtypeStruct((N, C2, 1), jnp.float32),
                   jax.ShapeDtypeStruct((N, C2, 1), jnp.float32)),
        grid_spec=pltpu.PrefetchScalarGridSpec(
            num_scalar_prefetch=0,
            grid=(N, nL),
            in_specs=[
                pl.BlockSpec((1, C2, TL), lambda n, l: (n, 0, l)),
                pl.BlockSpec((1, C2, 1), lambda n, l: (0, 0, 0)),
                pl.BlockSpec((1, C2, 1), lambda n, l: (0, 0, 0)),
            ],
            out_specs=(
                pl.BlockSpec((1, C2, 1), lambda n, l: (n, 0, 0)),
                pl.BlockSpec((1, C2, 1), lambda n, l: (n, 0, 0)),
            ),
            scratch_shapes=[pltpu.VMEM((1, C2, 1), jnp.float32),
                            pltpu.VMEM((1, C2, 1), jnp.float32)],
        ),
        compiler_params=pltpu.CompilerParams(
            dimension_semantics=("parallel", "arbitrary"),
            vmem_limit_bytes=vmem_limit,
        ),
        cost_estimate=pl.CostEstimate(
            flops=3 * N * C2 * L2,
            transcendentals=N,
            bytes_accessed=N * C2 * L2 * itemsize + 8 * N * C2,
        ),
    )(x2, w2, b2)

    # Pass 2: normalize; fully parallel grid (both v7x TensorCores busy).
    out = pl.pallas_call(
        _apply_kernel,
        out_shape=jax.ShapeDtypeStruct((N, C2, L2), x2.dtype),
        grid_spec=pltpu.PrefetchScalarGridSpec(
            num_scalar_prefetch=0,
            grid=(N, nL),
            in_specs=[
                pl.BlockSpec((1, C2, TL), lambda n, l: (n, 0, l)),
                pl.BlockSpec((1, C2, 1), lambda n, l: (n, 0, 0)),
                pl.BlockSpec((1, C2, 1), lambda n, l: (n, 0, 0)),
            ],
            out_specs=pl.BlockSpec((1, C2, TL), lambda n, l: (n, 0, l)),
        ),
        compiler_params=pltpu.CompilerParams(
            dimension_semantics=("parallel", "parallel"),
            vmem_limit_bytes=vmem_limit,
        ),
        cost_estimate=pl.CostEstimate(
            flops=2 * N * C2 * L2,
            transcendentals=0,
            bytes_accessed=2 * N * C2 * L2 * itemsize + 8 * N * C2,
        ),
    )(x2, scale, shift)
    return out


# ---------------------------------------------------------------------------
# Public API
# ---------------------------------------------------------------------------

def _gln_3d(x3, w_flat, b_flat, eps, force_two_pass=False):
    N, C, L = x3.shape
    itemsize = jnp.dtype(x3.dtype).itemsize

    # Sublane-density refold for small C; keeps lanes 128-aligned.
    r = _refold_factor(C, L, itemsize)
    C2, L2 = C * r, L // r
    x2 = x3.reshape(N, C2, L2)
    w2 = jnp.repeat(w_flat.astype(jnp.float32), r).reshape(1, C2, 1)
    b2 = jnp.repeat(b_flat.astype(jnp.float32), r).reshape(1, C2, 1)

    slab_bytes = C2 * L2 * itemsize
    if slab_bytes <= _FUSED_MAX_SLAB_BYTES and not force_two_pass:
        out2 = _gln_fused(x2, w2, b2, eps)
    else:
        out2 = _gln_two_pass(x2, w2, b2, eps)
    return out2.reshape(N, C, L)


def global_layer_norm(x, weight=None, bias=None, eps=1e-8, force_two_pass=False):
    """GlobalLayerNorm forward.

    x: (N, C, H, W) with weight/bias (C, 1, 1), or (N, C, L) with (C, 1).
    weight/bias may be None (elementwise_affine=False).
    """
    if x.ndim not in (3, 4):
        return x  # module is a no-op for other ranks
    if x.ndim == 4:
        N, C, H, W = x.shape
        x3 = x.reshape(N, C, H * W)
    else:
        N, C, L = x.shape
        x3 = x
    w_flat = jnp.ones((C,), jnp.float32) if weight is None else weight.reshape(C)
    b_flat = jnp.zeros((C,), jnp.float32) if bias is None else bias.reshape(C)
    out3 = _gln_3d(x3, w_flat, b_flat, eps, force_two_pass=force_two_pass)
    return out3.reshape(x.shape)


def global_layer_norm_ref(x, weight, bias, eps=1e-8):
    """Pure-JAX reference mirroring the PyTorch forward (3-D and 4-D branches)."""
    axes = tuple(range(1, x.ndim))
    mean = jnp.mean(x, axis=axes, keepdims=True)
    var = jnp.mean((x - mean) ** 2, axis=axes, keepdims=True)
    wshape = (1, -1) + (1,) * (x.ndim - 2)
    return (weight.reshape(wshape) * (x - mean) / jnp.sqrt(var + eps)
            + bias.reshape(wshape))


if __name__ == "__main__":
    key = jax.random.PRNGKey(0)
    k_x4, k_w4, k_b4, k_x3 = jax.random.split(key, 4)

    # 4-D branch (module shape=4): small, lane-refolded (C=4 -> C2=8, L2=128).
    N, C, H, W = 2, 4, 16, 16
    x4 = jax.random.normal(k_x4, (N, C, H, W), dtype=jnp.float32)
    w4 = (1.0 + 0.1 * jax.random.normal(k_w4, (C, 1, 1))).astype(jnp.float32)
    b4 = (0.1 * jax.random.normal(k_b4, (C, 1, 1))).astype(jnp.float32)
    ref4 = global_layer_norm_ref(x4, w4, b4)

    out_fused = jax.block_until_ready(global_layer_norm(x4, w4, b4))
    assert jnp.allclose(out_fused, ref4, atol=1e-5, rtol=1e-5), "fused path mismatch"

    out_tiled = jax.block_until_ready(global_layer_norm(x4, w4, b4, force_two_pass=True))
    assert jnp.allclose(out_tiled, ref4, atol=1e-5, rtol=1e-5), "two-pass path mismatch"

    # 3-D branch (module shape=3).
    N3, C3, L3 = 2, 8, 256
    x3 = jax.random.normal(k_x3, (N3, C3, L3), dtype=jnp.float32)
    w3 = jnp.ones((C3, 1), jnp.float32)
    b3 = jnp.zeros((C3, 1), jnp.float32)
    ref3 = global_layer_norm_ref(x3, w3, b3)
    out3 = jax.block_until_ready(global_layer_norm(x3, w3, b3))
    assert jnp.allclose(out3, ref3, atol=1e-5, rtol=1e-5), "3-D branch mismatch"

    print("KERNEL_OK")
</pallas_src>

<mosaic_0001>
module attributes {stable_mosaic.version = 11 : i64} {
  func.func @_fused_kernel(%arg0: i32, %arg1: memref<1x8x128xf32, #tpu.memory_space<vmem>>, %arg2: memref<1x8x1xf32, #tpu.memory_space<vmem>>, %arg3: memref<1x8x1xf32, #tpu.memory_space<vmem>>, %arg4: memref<1x8x128xf32, #tpu.memory_space<vmem>>) attributes {dimension_semantics = [#tpu.dimension_semantics<parallel>], iteration_bounds = array<i64: 2>, scalar_prefetch = 0 : i64, scratch_operands = 0 : i64, tpu.core_type = #tpu.core_type<tc>, window_params = [{transform_indices = @transform_0, window_bounds = array<i64: 1, 8, 128>}, {pipeline_mode = #tpu.pipeline_mode<synchronous>, transform_indices = @transform_1, window_bounds = array<i64: 1, 8, 1>}, {pipeline_mode = #tpu.pipeline_mode<synchronous>, transform_indices = @transform_2, window_bounds = array<i64: 1, 8, 1>}, {transform_indices = @transform_3, window_bounds = array<i64: 1, 8, 128>}]} {
    %c0 = arith.constant 0 : index
    %c0_0 = arith.constant 0 : index
    %c0_1 = arith.constant 0 : index
    %0 = vector.load %arg1[%c0, %c0_0, %c0_1] : memref<1x8x128xf32, #tpu.memory_space<vmem>>, vector<1x8x128xf32>
    %1 = vector.shape_cast %0 : vector<1x8x128xf32> to vector<1x1x8x128xf32>
    %cst = arith.constant dense<0.000000e+00> : vector<1xf32>
    %2 = vector.multi_reduction <add>, %1, %cst [1, 2, 3] : vector<1x1x8x128xf32> to vector<1xf32>
    %3 = vector.shape_cast %2 : vector<1xf32> to vector<1x1x1x1xf32>
    %4 = vector.extract %3[0, 0, 0, 0] : f32 from vector<1x1x1x1xf32>
    %5 = arith.mulf %0, %0 : vector<1x8x128xf32>
    %6 = vector.shape_cast %5 : vector<1x8x128xf32> to vector<1x1x8x128xf32>
    %cst_2 = arith.constant dense<0.000000e+00> : vector<1xf32>
    %7 = vector.multi_reduction <add>, %6, %cst_2 [1, 2, 3] : vector<1x1x8x128xf32> to vector<1xf32>
    %8 = vector.shape_cast %7 : vector<1xf32> to vector<1x1x1x1xf32>
    %9 = vector.extract %8[0, 0, 0, 0] : f32 from vector<1x1x1x1xf32>
    %cst_3 = arith.constant 1.024000e+03 : f32
    %10 = arith.divf %4, %cst_3 : f32
    %cst_4 = arith.constant 1.024000e+03 : f32
    %11 = arith.divf %9, %cst_4 : f32
    %12 = arith.mulf %10, %10 : f32
    %13 = arith.subf %11, %12 : f32
    %cst_5 = arith.constant 0.000000e+00 : f32
    %14 = arith.maximumf %13, %cst_5 : f32
    %cst_6 = arith.constant 9.99999993E-9 : f32
    %15 = arith.addf %14, %cst_6 : f32
    %16 = math.rsqrt %15 : f32
    %c0_7 = arith.constant 0 : index
    %c0_8 = arith.constant 0 : index
    %c0_9 = arith.constant 0 : index
    %17 = vector.load %arg2[%c0_7, %c0_8, %c0_9] : memref<1x8x1xf32, #tpu.memory_space<vmem>>, vector<1x8x1xf32>
    %18 = vector.broadcast %16 : f32 to vector<1x8x1xf32>
    %19 = arith.mulf %17, %18 : vector<1x8x1xf32>
    %c0_10 = arith.constant 0 : index
    %c0_11 = arith.constant 0 : index
    %c0_12 = arith.constant 0 : index
    %20 = vector.load %arg3[%c0_10, %c0_11, %c0_12] : memref<1x8x1xf32, #tpu.memory_space<vmem>>, vector<1x8x1xf32>
    %21 = vector.broadcast %10 : f32 to vector<1x8x1xf32>
    %22 = arith.mulf %19, %21 : vector<1x8x1xf32>
    %23 = arith.subf %20, %22 : vector<1x8x1xf32>
    %24 = vector.broadcast %19 : vector<1x8x1xf32> to vector<1x8x128xf32>
    %25 = arith.mulf %24, %0 : vector<1x8x128xf32>
    %26 = vector.broadcast %23 : vector<1x8x1xf32> to vector<1x8x128xf32>
    %27 = arith.addf %25, %26 : vector<1x8x128xf32>
    %c0_13 = arith.constant 0 : index
    %c0_14 = arith.constant 0 : index
    %c0_15 = arith.constant 0 : index
    %28 = vector.load %arg4[%c0_13, %c0_14, %c0_15] : memref<1x8x128xf32, #tpu.memory_space<vmem>>, vector<1x8x128xf32>
    tpu.vector_store %arg4[%c0_13, %c0_14, %c0_15], %27 {strides = array<i32>} : memref<1x8x128xf32, #tpu.memory_space<vmem>>, vector<1x8x128xf32>,
    return
  }
  func.func @transform_0(%arg0: i32) -> (i32, i32, i32) {
    %c0_i32 = arith.constant 0 : i32
    %c0_i32_0 = arith.constant 0 : i32
    %c0_i32_1 = arith.constant 0 : i32
    return %arg0, %c0_i32, %c0_i32_0 : i32, i32, i32
  }
  func.func @transform_1(%arg0: i32) -> (i32, i32, i32) {
    %c0_i32 = arith.constant 0 : i32
    %c0_i32_0 = arith.constant 0 : i32
    %c0_i32_1 = arith.constant 0 : i32
    %c0_i32_2 = arith.constant 0 : i32
    return %c0_i32, %c0_i32_0, %c0_i32_1 : i32, i32, i32
  }
  func.func @transform_2(%arg0: i32) -> (i32, i32, i32) {
    %c0_i32 = arith.constant 0 : i32
    %c0_i32_0 = arith.constant 0 : i32
    %c0_i32_1 = arith.constant 0 : i32
    %c0_i32_2 = arith.constant 0 : i32
    return %c0_i32, %c0_i32_0, %c0_i32_1 : i32, i32, i32
  }
  func.func @transform_3(%arg0: i32) -> (i32, i32, i32) {
    %c0_i32 = arith.constant 0 : i32
    %c0_i32_0 = arith.constant 0 : i32
    %c0_i32_1 = arith.constant 0 : i32
    return %arg0, %c0_i32, %c0_i32_0 : i32, i32, i32
  }
}

</mosaic_0001>

<bundles_post_ra>
// kernel: tpu_custom_call.1
= control target key start
LH: loop header
LB: loop body
LE: loop exit
PB: predicated region body
PF: predicated region fallthrough
CT: control target
= control target key end

     0   :  { %8 = vsyncpa [#allocation3], 0  ;;  %s565_s0 = inlined_call_operand.vmem [shape: f32[2,8,128], index: 0, kind: input, shape index: {}]   ;;  %s566_s1 = inlined_call_operand.vmem [shape: f32[1,8,1], index: 1, kind: input, shape index: {}]   ;;  %s567_s2 = inlined_call_operand.vmem [shape: f32[1,8,1], index: 2, kind: input, shape index: {}]   ;;  %s568_s3 = inlined_call_operand.hbm [shape: f32[2,8,128], index: 3, kind: output, shape index: {}]  }
   0x1   :  { %10 = vsyncpa [#allocation3 + $0x1], 0  ;;  %s468_s12 = smov 0   ;;  %s470_s13 = smov 0  }
   0x2   :  { %s472_s14 = smov 0   ;;  %s474_s15 = smov 0  }
   0x3 LB: > { %s489_s16 = sadd.s32 4294967295, %s443_s15   ;;  %s315_s17 = sadd.s32 4294967294, %s443_s15   ;;  %s443_s15 = sphi %s474_s15, %s574_s15   ;;  %s439_s14 = sphi %s472_s14, %s573_s14   ;;  %s435_s13 = sphi %s470_s13, %s572_s13   ;;  %s431_s12 = sphi %s468_s12, %s571_s12  }
   0x4   : > { %s493_s18 = sadd.s32 1, %s443_s15   ;;  %s91_s19 = sadd.s32 1, %s439_s14 }
   0x5   : > { %s88_s20 = ssub.s32 %s443_s15, %s493_s18  ;;  %p101_p0 = scmp.ne.s32.totalorder %s439_s14, %s435_s13 }
   0x6   : > { %p89_p1 = scmp.eq.s32.totalorder %s88_s20, 0  ;;  %p102_p2 = scmp.eq.s32.totalorder %s489_s16, 1 }
   0x7   : > { %p107_p3 = scmp.ne.s32.totalorder %s435_s13, %s431_s12  ;;  %p108_p4 = scmp.eq.s32.totalorder %s315_s17, 1 }
   0x8   : > { %s504_s21 = scalar_select %p89_p1, %s439_s14, %s91_s19  }
   0x9   : > { %p506_p5 = por %p102_p2, %p101_p0  ;;  %p510_p6 = por %p108_p4, %p107_p3 }
   0xa   : > { %p318_p7 = scmp.ge.s32.totalorder %s443_s15, 1  ;;  %p139_p8 = scmp.lt.s32.totalorder %s443_s15, 3 }
   0xc   : > { %p140_p9 = pnand %p318_p7, %p139_p8 }
   0xd   : > { %p162_p10 = scmp.lt.s32.totalorder (!%p140_p9), %s489_s16, 1  ;;  %s446_s9 = smov (!%p140_p9), 0.0  }
   0xe   : > { %143 = sbr.rel (%p140_p9) target bundleno = 420 (0x1a4), region = 32  ;;  %s159_s26 = sand.u32 (!%p140_p9), 1, %s435_s13  }
   0xf   : > { %s319_s27 = sshll.u32 (!%p140_p9), %s159_s26, 3  ;;  %s401_s17 = scalar_lea.hbm (!%p140_p9), %s568_s3, 16 }
  0x13   : > { %s163_s24 = scalar_select %p162_p10, %s489_s16, 1  ;;  %v445_v2 = vmov 1024.0   ;;  %v447_v31 = vmov 0   ;;  %v220_v32 = vld [vmem:[%s566_s1] sm:$0xff] }
  0x14   : > { %377 = vrcp.f32 %v445_v2  ;;  %375 = vset.pattern.permute.xlu1 %v447_v31  ;;  %376 = vset.pattern.permute.xlu0 %v447_v31  ;;  %v223_v37 = vld [vmem:[%s567_s2] sm:$0xff] }
  0x15   : > { %s320_s25 = sshll.u32 %s163_s24, 3 }
  0x16   : > { %s165_s28 = scalar_lea.vmem %s565_s0, %s320_s25 }
  0x17   : > { %v521_v0 = vld [vmem:[%s165_s28] sm:$0xff]  ;;  %s322_s28 = sshll.u32 %s489_s16, 3 }
  0x18   : > { %167 = vadd.xlane.f32.xlu0 %v521_v0  ;;  %v176_v1 = vmul.f32 %v521_v0, %v521_v0 }
  0x1a   : > { %v378_v3 = vpop.eup %377 }
  0x1b   : > { %v187_v7 = vmul.f32 1024.0, %v378_v3  ;;  %vm191_vm0 = vweird.f32 %v378_v3 }
  0x1d   : > { %v188_v10 = vsub.f32 1.0, %v187_v7 }
  0x1f   : > { %v189_v16 = vmul.f32 %v378_v3, %v188_v10 }
  0x20   : > { %177 = vadd.xlane.f32.xlu0 %v176_v1 }
  0x21   : > { %v190_v19 = vadd.f32 %v378_v3, %v189_v16 }
  0x23   : > { %v192_v22 = vsel %vm191_vm0, %v378_v3, %v190_v19 }
  0x8b   : > { %v168_v4 = vpop.xlane.xlu0 %167 }
  0x8c   : > { %v169_v5 = vrot.slane %v168_v4, 4 }
  0x8e   : > { %v170_v6 = vadd.f32 %v169_v5, %v168_v4 }
  0x90   : > { %v171_v8 = vrot.slane %v170_v6, 2 }
  0x92   : > { %v172_v9 = vadd.f32 %v171_v8, %v170_v6 }
  0x93   : > { %v178_v11 = vpop.xlane.xlu0 %177 }
  0x94   : > { %v179_v12 = vrot.slane %v178_v11, 4  ;;  %v173_v13 = vrot.slane %v172_v9, 1 }
  0x96   : > { %v180_v14 = vadd.f32 %v179_v12, %v178_v11  ;;  %v174_v15 = vadd.f32 %v173_v13, %v172_v9 }
  0x98   : > { %v181_v17 = vrot.slane %v180_v14, 2  ;;  %325 = vpush %v174_v15 }
  0x9a   : > { %v182_v18 = vadd.f32 %v181_v17, %v180_v14 }
  0x9c   : > { %v183_v20 = vrot.slane %v182_v18, 1 }
  0x9e   : > { %v184_v21 = vadd.f32 %v183_v20, %v182_v18 }
  0xa0   : > { %327 = vpush %v184_v21 }
  0xa1   : > { %329 = vpush %v192_v22 }
  0xc9   : > { %s326_s29 = spop %325 }
  0xd1   : > { %s328_s30 = spop %327 }
  0xd2   : > { %s330_s4 = spop %329 }
  0xd3   : > { %s194_s5 = smul.f32 %s330_s4, %s326_s29 }
  0xd4   : > { %s203_s6 = smul.f32 %s330_s4, %s328_s30  ;;  %s251_s4 = scalar_lea.hbm %s568_s3, %s322_s28 }
  0xd5   : > { %s204_s7 = smul.f32 %s194_s5, %s194_s5  ;;  %v224_v35 = vstv %s194_s5  ;;  %s241_s5 = scalar_lea.sflag [#allocation3], %s159_s26 }
  0xd7   : > { %s205_s8 = ssub.f32 %s203_s6, %s204_s7  ;;  %s161_s6 = scalar_lea.vmem [#allocation2], %s319_s27 }
  0xd8   : > { %s253_s7 = sshll.u32 %s161_s6, 4  ;;  %s254_s7 = int_to_ptr.vmem [resolvable:$true] %s253_s7 }
  0xd9   : > { %s206_s10 = smax.f32 %s446_s9, %s205_s8  ;;  %s255_s8 = sshll.u32 %s251_s4, 4  ;;  %s256_s8 = int_to_ptr.hbm [resolvable:$true] %s255_s8 }
  0xda   : > { %s207_s11 = sadd.f32 1e-08, %s206_s10  ;;  %s395_s9 = sshra.s32 %s256_s8, 4  ;;  %s396_s9 = int_to_ptr.hbm [resolvable:$true] %s395_s9 }
  0xdb   : > { %s397_s10 = scalar_lea.hbm %s396_s9, 8  ;;  %p402_p0 = scmp.lt.s32.totalorder %s396_s9, %s568_s3 }
  0xdc   : > { %v208_v23 = vstv %s207_s11  ;;  %p398_p11 = scmp.ne.s32.totalorder %s396_s9, %s397_s10  ;;  %p403_p1 = scmp.lt.s32.totalorder %s401_s17, %s397_s10 }
  0xdd   : > { %379 = vrsqrt.f32 %v208_v23  ;;  %vm215_vm2 = vweird.f32 %v208_v23 }
  0xde   : > { %p399_p12 = pnand %p398_p11, %p506_p5  ;;  %p404_p2 = por %p403_p1, %p402_p0 }
  0xe0   : > { %p400_p13 = pneg %p399_p12 }
  0xe2   : > { %p405_p3 = pnand %p404_p2, %p400_p13 }
  0xe3   : > { %v380_v24 = vpop.eup %379 }
  0xe4   : > { %v210_v25 = vmul.f32 %v380_v24, %v208_v23  ;;  %vm216_vm1 = vweird.f32 %v380_v24 }
  0xe5   : > { %vm217_vm3 = vmor %vm215_vm2, %vm216_vm1 }
  0xe6   : > { %v211_v26 = vmul.f32 %v380_v24, %v210_v25 }
  0xe8   : > { %v212_v27 = vmul.f32 0.5, %v211_v26 }
  0xea   : > { %v213_v28 = vsub.f32 1.5, %v212_v27 }
  0xec   : > { %v214_v29 = vmul.f32 %v380_v24, %v213_v28 }
  0xee   : > { %v218_v30 = vsel %vm217_vm3, %v380_v24, %v214_v29 }
  0xef   : > { %331 = vpush %v218_v30 }
 0x120   : > { %s332_s20 = spop %331 }
 0x121   : > { %v221_v33 = vstv %s332_s20 }
 0x122   : > { %v222_v34 = vmul.f32 %v221_v33, %v220_v32 }
 0x124   : > { %229 = vperm.xlu1 %375, %v222_v34   ;;  %v225_v36 = vmul.f32 %v224_v35, %v222_v34 }
 0x126   : > { %v226_v38 = vsub.f32 %v223_v37, %v225_v36 }
 0x12c   : > { %235 = vperm.xlu1 %375, %v226_v38  }
 0x196   : > { %v230_v39 = vpop.permute.xlu1 %229 }
 0x197   : > { %v232_v40 = vmul.f32 %v230_v39, %v521_v0 }
 0x19e   : > { %v236_v41 = vpop.permute.xlu1 %235 }
 0x19f   : > { %v238_v42 = vadd.f32 %v236_v41, %v232_v40 }
 0x1a1   : > { %239 = vst [vmem:[%s161_s6] sm:$0xff] %v238_v42 }
 0x1a2   : > { %408 = shalt.err (!%p405_p3)
}
 0x1a3   : > { %333 = dma.vmem_to_hbm [thread:$0]  (%p506_p5), %s254_s7, 128, %s256_s8, %s241_s5  }
 0x1a4 PF: > { %p339_p4 = scmp.ge.s32.totalorder %s443_s15, 2  ;;  %s267_s24 = sand.u32 1, %s431_s12  }
 0x1a5   : > { %s268_s25 = scalar_lea.sflag [#allocation3], %s267_s24 }
 0x1a6   : > { %p336_p7 = pnand %p339_p4, %p510_p6 }
 0x1a8   : > { %p337_p8 = pneg %p336_p7 }
 0x1aa   : > { %426 = dma.done.wait (%p337_p8), %s268_s25, 128  }
 0x1ab   : > { %428 = vsyncadd (%p337_p8), %s268_s25, 4294967168  ;;  %p13_p9 = scmp.ge.s32.totalorder %s493_s18, 4   ;;  %s571_s12 = smov %s435_s13 }
 0x1ac   : > { %s572_s13 = smov %s439_s14  ;;  %s573_s14 = smov %s504_s21 }
 0x1ad   : > { %s574_s15 = smov %s493_s18  ;;  %15 = sbr.rel (!%p13_p9) target bundleno = 3 (0x3), region = 67 }
 0x1b2   :  { %274 = vsyncpa [#allocation3], 1 }
 0x1b3   :  { %276 = vsyncpa [#allocation3 + $0x1], 1 }

</bundles_post_ra>
